<compile_context>
chip_gen: v7x
topology: tpu7x:2x2x1
jax: 0.10.0
libtpu: 0.0.40
codegen_flags: <defaults>
</compile_context>

<pallas_src>
import jax
import jax.numpy as jnp
from jax import lax
from jax.experimental import pallas as pl
from jax.experimental.pallas import tpu as pltpu  # noqa: F401  (TPU backend)

EPS_BN = 1e-5
EPS_LN = 1e-5
EPS_COS = 1e-8

G1_PAD = 128          # 25-wide per-object feature padded to one full lane tile
H_DIM = 256


# ---------------------------------------------------------------------------
# Fused Pallas kernel
# ---------------------------------------------------------------------------
def _fused_kernel(lang_ref, feats_ref, fidx_ref, lidx_ref,
                  lw1_ref, lb1_ref, lw2_ref, lb2_ref,
                  g1w_ref, g1b_ref,
                  g2wa_ref, g2wb_ref, g2b_ref,
                  vw1a_ref, vw1b_ref, vb1_ref, lng_ref, lnb_ref,
                  vw2_ref, vb2_ref,
                  o_ref):
    f32 = jnp.float32
    bf16 = jnp.bfloat16

    Bp = lang_ref.shape[0]
    Np = feats_ref.shape[0]
    Mp = fidx_ref.shape[0]

    # ---- lang_emb_fc (BatchNorm folded into W1/b1): Linear -> ReLU -> Linear
    lx = lang_ref[...].astype(bf16)
    h = jnp.dot(lx, lw1_ref[...], preferred_element_type=f32) + lb1_ref[...]
    h = jnp.maximum(h, 0.0)                     # Dropout(0.15) is identity at eval
    lang_emb = (jnp.dot(h.astype(bf16), lw2_ref[...], preferred_element_type=f32)
                + lb2_ref[...])                 # (Bp, 256) f32

    # TODO(synk): DynamicEdgeConv / DynamicEdgeConv2 bodies (kNN graph + edge max
    # aggregation over support_xyz/batch_index) are not in the provided source;
    # stand-in is a per-node Linear+ReLU with the correct in/out widths.
    # ---- gcn stand-in over all candidate objects
    fx = feats_ref[...].astype(bf16)            # (Np, 128), cols >= 25 are zero
    g1 = jnp.dot(fx, g1w_ref[...], preferred_element_type=f32) + g1b_ref[...]
    g1 = jnp.maximum(g1, 0.0)                   # (Np, 128)

    # ---- in-VMEM gathers via one-hot selection matmuls (MXU)
    eq_f = lax.broadcasted_iota(jnp.int32, (Mp, Np), 1) == fidx_ref[...]
    eq_l = lax.broadcasted_iota(jnp.int32, (Mp, Bp), 1) == lidx_ref[...]
    fsel = jnp.where(eq_f, 1.0, 0.0).astype(bf16)      # (Mp, Np)
    lsel = jnp.where(eq_l, 1.0, 0.0)                   # (Mp, Bp) f32

    g1_sel = jnp.dot(fsel, g1.astype(bf16), preferred_element_type=f32)   # (Mp,128)
    feats_sel = jnp.dot(fsel, fx, preferred_element_type=f32)             # (Mp,128)
    lang_sel = jnp.dot(lsel, lang_emb, preferred_element_type=f32)        # (Mp,256)

    # ---- gcn2 stand-in on concat(g1_sel, feats_25): split-K matmul (no concat)
    g2 = (jnp.dot(g1_sel.astype(bf16), g2wa_ref[...], preferred_element_type=f32)
          + jnp.dot(feats_sel.astype(bf16), g2wb_ref[...], preferred_element_type=f32)
          + g2b_ref[...])
    g2 = jnp.maximum(g2, 0.0)                   # (Mp, 128)

    # ---- vis_emb_fc on concat(g1_sel, g2): Linear -> LayerNorm -> ReLU -> Linear
    v = (jnp.dot(g1_sel.astype(bf16), vw1a_ref[...], preferred_element_type=f32)
         + jnp.dot(g2.astype(bf16), vw1b_ref[...], preferred_element_type=f32)
         + vb1_ref[...])
    mu = jnp.mean(v, axis=-1, keepdims=True)
    var = jnp.mean((v - mu) * (v - mu), axis=-1, keepdims=True)
    v = (v - mu) * lax.rsqrt(var + EPS_LN) * lng_ref[...] + lnb_ref[...]
    v = jnp.maximum(v, 0.0)                     # Dropout is identity at eval
    f = (jnp.dot(v.astype(bf16), vw2_ref[...], preferred_element_type=f32)
         + vb2_ref[...])                        # (Mp, 256) f32

    # ---- cosine similarity (f32; rsqrt goes to the EUP slot, no divide/sqrt)
    num = jnp.sum(f * lang_sel, axis=-1, keepdims=True)
    fn2 = jnp.sum(f * f, axis=-1, keepdims=True)
    ln2 = jnp.sum(lang_sel * lang_sel, axis=-1, keepdims=True)
    inv = (lax.rsqrt(jnp.maximum(fn2, EPS_COS * EPS_COS))
           * lax.rsqrt(jnp.maximum(ln2, EPS_COS * EPS_COS)))
    scores = num * inv                          # (Mp, 1)

    # Lane-dense store: broadcast across the 128 lanes; column 0 sliced outside.
    o_ref[...] = jnp.broadcast_to(scores, (Mp, 128))


# ---------------------------------------------------------------------------
# Parameter construction (deterministic, PyTorch-shape-consistent)
# ---------------------------------------------------------------------------
def make_params(key, l_dim=256, h_dim=256, v_dim=256,
                input_feature_dim=4, num_classes=18):
    f32, bf16 = jnp.float32, jnp.bfloat16
    ks = jax.random.split(key, 8)
    s = 0.02
    g1_in = 3 + input_feature_dim + num_classes          # 25
    g2_in = 153

    # Raw f32 parameters, nn.Linear weights already transposed to (in, out).
    lang_w1 = jax.random.normal(ks[0], (l_dim, h_dim), f32) * s
    lang_b1 = jnp.zeros((h_dim,), f32)
    bn_gamma = jnp.ones((h_dim,), f32)                   # weight_initialization()
    bn_beta = jnp.zeros((h_dim,), f32)
    bn_rm = jnp.zeros((h_dim,), f32)
    bn_rv = jnp.ones((h_dim,), f32)
    lang_w2 = jax.random.normal(ks[1], (h_dim, h_dim), f32) * s
    lang_b2 = jnp.zeros((h_dim,), f32)
    vis_w1 = jax.random.normal(ks[2], (v_dim, h_dim), f32) * s
    vis_b1 = jnp.zeros((h_dim,), f32)
    ln_gamma = jnp.ones((h_dim,), f32)
    ln_beta = jnp.zeros((h_dim,), f32)
    vis_w2 = jax.random.normal(ks[3], (h_dim, h_dim), f32) * s
    vis_b2 = jnp.zeros((h_dim,), f32)
    g1_w = jax.random.normal(ks[4], (g1_in, 128), f32) * s
    g1_b = jnp.zeros((128,), f32)
    g2_w = jax.random.normal(ks[5], (g2_in, 128), f32) * s
    g2_b = jnp.zeros((128,), f32)

    # Fold BatchNorm1d (eval mode, running stats) into lang layer 1.
    scale = bn_gamma * lax.rsqrt(bn_rv + EPS_BN)
    lang_w1_f = lang_w1 * scale[None, :]
    lang_b1_f = (lang_b1 - bn_rm) * scale + bn_beta

    # Pad odd widths to 128-lane tiles and split concat weights into 128-row halves.
    g1_w_pad = jnp.zeros((G1_PAD, 128), f32).at[:g1_in].set(g1_w)
    g2_w_a = g2_w[:128]                                                   # gnn1 part
    g2_w_b = jnp.zeros((G1_PAD, 128), f32).at[:g2_in - 128].set(g2_w[128:])  # feats25 part
    vis_w1_a = vis_w1[:128]
    vis_w1_b = vis_w1[128:]

    return {
        "lang_w1": lang_w1_f.astype(bf16), "lang_b1": lang_b1_f.reshape(1, -1),
        "lang_w2": lang_w2.astype(bf16),   "lang_b2": lang_b2.reshape(1, -1),
        "g1_w": g1_w_pad.astype(bf16),     "g1_b": g1_b.reshape(1, -1),
        "g2_w_a": g2_w_a.astype(bf16),     "g2_w_b": g2_w_b.astype(bf16),
        "g2_b": g2_b.reshape(1, -1),
        "vis_w1_a": vis_w1_a.astype(bf16), "vis_w1_b": vis_w1_b.astype(bf16),
        "vis_b1": vis_b1.reshape(1, -1),
        "ln_gamma": ln_gamma.reshape(1, -1), "ln_beta": ln_beta.reshape(1, -1),
        "vis_w2": vis_w2.astype(bf16),     "vis_b2": vis_b2.reshape(1, -1),
    }


def _round_up(x, m):
    return ((x + m - 1) // m) * m


# ---------------------------------------------------------------------------
# Forward pass (mirrors RelationModule.forward, eval mode)
# ---------------------------------------------------------------------------
def relation_module_forward(params, lang_rel_feats, lang_scores, feats,
                            support_xyz, batch_index, filtered_index):
    f32 = jnp.float32
    B = lang_rel_feats.shape[0]
    N, fdim = feats.shape
    M = filtered_index.shape[0]

    # lang_cls_pred = argmax(lang_scores, dim=1): consumed only by the host-side
    # filter_candidates bookkeeping whose outputs (feats/batch_index/filtered_index)
    # are already inputs here.
    _ = jnp.argmax(lang_scores, axis=1)

    # TODO(synk): filter_candidates is host-side, data-dependent Python list/dict
    # bookkeeping over variable-length scenes; its outputs are kernel inputs.
    # support_xyz / batch_index would feed the real DynamicEdgeConv kNN graph.
    del support_xyz

    Bp = max(_round_up(B, 8), 8)
    Np = max(_round_up(N, 8), 8)
    Mp = max(_round_up(M, 8), 8)

    lang_x = jnp.zeros((Bp, lang_rel_feats.shape[1]), f32).at[:B].set(
        lang_rel_feats.astype(f32))
    feats_pad = jnp.zeros((Np, G1_PAD), f32).at[:N, :fdim].set(feats.astype(f32))

    lang_gather = batch_index[filtered_index].astype(jnp.int32)           # (M,)
    fidx = jnp.full((Mp, 1), -1, jnp.int32).at[:M, 0].set(
        filtered_index.astype(jnp.int32))
    lidx = jnp.full((Mp, 1), -1, jnp.int32).at[:M, 0].set(lang_gather)

    args = (lang_x, feats_pad, fidx, lidx,
            params["lang_w1"], params["lang_b1"], params["lang_w2"], params["lang_b2"],
            params["g1_w"], params["g1_b"],
            params["g2_w_a"], params["g2_w_b"], params["g2_b"],
            params["vis_w1_a"], params["vis_w1_b"], params["vis_b1"],
            params["ln_gamma"], params["ln_beta"],
            params["vis_w2"], params["vis_b2"])

    # TODO(synk): for large N/M in production, add a row grid over Mp/Np
    # (row tile >= 256, dimension_semantics=('parallel',)) instead of whole-array
    # blocks; at these sizes everything fits VMEM in a single block.
    in_specs = [pl.BlockSpec(a.shape, lambda *_, nd=a.ndim: (0,) * nd) for a in args]
    out_specs = pl.BlockSpec((Mp, 128), lambda *_: (0, 0))

    scores_slab = pl.pallas_call(
        _fused_kernel,
        out_shape=jax.ShapeDtypeStruct((Mp, 128), f32),
        in_specs=in_specs,
        out_specs=out_specs,
    )(*args)

    return scores_slab[:M, 0]                                             # (M,)


# ---------------------------------------------------------------------------
if __name__ == "__main__":
    key = jax.random.PRNGKey(0)
    k_param, k_lang, k_score, k_feat, k_xyz = jax.random.split(key, 5)

    B = 2                    # batch size (scenes)
    num_classes = 18
    input_feature_dim = 4    # -> gcn in_dim = 3 + 4 + 18 = 25 = feats width
    objs_per_scene = 4
    N = B * objs_per_scene   # total candidate objects across scenes
    l_dim = 256

    params = make_params(k_param, input_feature_dim=input_feature_dim,
                         num_classes=num_classes)

    lang_rel_feats = jax.random.normal(k_lang, (B, l_dim), jnp.float32)
    lang_scores = jax.random.normal(k_score, (B, num_classes), jnp.float32)

    # Synthetic filter_candidates outputs: [x,y,z, a,b,c,d, onehot(18)] per object.
    cont = jax.random.normal(k_feat, (N, 3 + input_feature_dim), jnp.float32)
    cls_ids = jnp.arange(N) % num_classes
    onehot = jax.nn.one_hot(cls_ids, num_classes, dtype=jnp.float32)
    feats = jnp.concatenate([cont, onehot], axis=1)                   # (N, 25)
    support_xyz = jax.random.normal(k_xyz, (N, 3), jnp.float32)
    batch_index = jnp.repeat(jnp.arange(B), objs_per_scene)           # (N,)
    filtered_index = jnp.array([1, 5], dtype=jnp.int32)               # (M,)

    fwd = jax.jit(relation_module_forward)
    scores = fwd(params, lang_rel_feats, lang_scores, feats, support_xyz,
                 batch_index, filtered_index)
    scores = jax.block_until_ready(scores)

    assert scores.shape == (filtered_index.shape[0],)
    assert bool(jnp.all(jnp.isfinite(scores)))
    print("KERNEL_OK")
</pallas_src>

<mosaic_0001>
module attributes {stable_mosaic.version = 11 : i64} {
  func.func @_fused_kernel(%arg0: memref<8x256xf32, #tpu.memory_space<vmem>>, %arg1: memref<8x128xf32, #tpu.memory_space<vmem>>, %arg2: memref<8x1xi32, #tpu.memory_space<vmem>>, %arg3: memref<8x1xi32, #tpu.memory_space<vmem>>, %arg4: memref<256x256xbf16, #tpu.memory_space<vmem>>, %arg5: memref<1x256xf32, #tpu.memory_space<vmem>>, %arg6: memref<256x256xbf16, #tpu.memory_space<vmem>>, %arg7: memref<1x256xf32, #tpu.memory_space<vmem>>, %arg8: memref<128x128xbf16, #tpu.memory_space<vmem>>, %arg9: memref<1x128xf32, #tpu.memory_space<vmem>>, %arg10: memref<128x128xbf16, #tpu.memory_space<vmem>>, %arg11: memref<128x128xbf16, #tpu.memory_space<vmem>>, %arg12: memref<1x128xf32, #tpu.memory_space<vmem>>, %arg13: memref<128x256xbf16, #tpu.memory_space<vmem>>, %arg14: memref<128x256xbf16, #tpu.memory_space<vmem>>, %arg15: memref<1x256xf32, #tpu.memory_space<vmem>>, %arg16: memref<1x256xf32, #tpu.memory_space<vmem>>, %arg17: memref<1x256xf32, #tpu.memory_space<vmem>>, %arg18: memref<256x256xbf16, #tpu.memory_space<vmem>>, %arg19: memref<1x256xf32, #tpu.memory_space<vmem>>, %arg20: memref<8x128xf32, #tpu.memory_space<vmem>>) attributes {dimension_semantics = [], scalar_prefetch = 0 : i64, scratch_operands = 0 : i64, tpu.core_type = #tpu.core_type<tc>} {
    %c0 = arith.constant 0 : index
    %c0_0 = arith.constant 0 : index
    %0 = vector.load %arg0[%c0, %c0_0] : memref<8x256xf32, #tpu.memory_space<vmem>>, vector<8x256xf32>
    %1 = arith.truncf %0 : vector<8x256xf32> to vector<8x256xbf16>
    %c0_1 = arith.constant 0 : index
    %c0_2 = arith.constant 0 : index
    %2 = vector.load %arg4[%c0_1, %c0_2] : memref<256x256xbf16, #tpu.memory_space<vmem>>, vector<256x256xbf16>
    %cst = arith.constant dense<0.000000e+00> : vector<8x256xf32>
    %3 = tpu.matmul %1, %2, %cst {dimension_numbers = #tpu.dot_dimension_numbers<[1], [0], [0], [1], [0, 0, 1, 1], [], []>} : vector<8x256xbf16>, vector<256x256xbf16>, vector<8x256xf32> -> vector<8x256xf32>
    %c0_3 = arith.constant 0 : index
    %c0_4 = arith.constant 0 : index
    %4 = vector.load %arg5[%c0_3, %c0_4] : memref<1x256xf32, #tpu.memory_space<vmem>>, vector<1x256xf32>
    %5 = vector.broadcast %4 : vector<1x256xf32> to vector<8x256xf32>
    %6 = arith.addf %3, %5 : vector<8x256xf32>
    %cst_5 = arith.constant 0.000000e+00 : f32
    %7 = vector.broadcast %cst_5 : f32 to vector<8x256xf32>
    %8 = arith.maximumf %6, %7 : vector<8x256xf32>
    %9 = arith.truncf %8 : vector<8x256xf32> to vector<8x256xbf16>
    %c0_6 = arith.constant 0 : index
    %c0_7 = arith.constant 0 : index
    %10 = vector.load %arg6[%c0_6, %c0_7] : memref<256x256xbf16, #tpu.memory_space<vmem>>, vector<256x256xbf16>
    %cst_8 = arith.constant dense<0.000000e+00> : vector<8x256xf32>
    %11 = tpu.matmul %9, %10, %cst_8 {dimension_numbers = #tpu.dot_dimension_numbers<[1], [0], [0], [1], [0, 0, 1, 1], [], []>} : vector<8x256xbf16>, vector<256x256xbf16>, vector<8x256xf32> -> vector<8x256xf32>
    %c0_9 = arith.constant 0 : index
    %c0_10 = arith.constant 0 : index
    %12 = vector.load %arg7[%c0_9, %c0_10] : memref<1x256xf32, #tpu.memory_space<vmem>>, vector<1x256xf32>
    %13 = vector.broadcast %12 : vector<1x256xf32> to vector<8x256xf32>
    %14 = arith.addf %11, %13 : vector<8x256xf32>
    %c0_11 = arith.constant 0 : index
    %c0_12 = arith.constant 0 : index
    %15 = vector.load %arg1[%c0_11, %c0_12] : memref<8x128xf32, #tpu.memory_space<vmem>>, vector<8x128xf32>
    %16 = arith.truncf %15 : vector<8x128xf32> to vector<8x128xbf16>
    %c0_13 = arith.constant 0 : index
    %c0_14 = arith.constant 0 : index
    %17 = vector.load %arg8[%c0_13, %c0_14] : memref<128x128xbf16, #tpu.memory_space<vmem>>, vector<128x128xbf16>
    %cst_15 = arith.constant dense<0.000000e+00> : vector<8x128xf32>
    %18 = tpu.matmul %16, %17, %cst_15 {dimension_numbers = #tpu.dot_dimension_numbers<[1], [0], [0], [1], [0, 0, 1, 1], [], []>} : vector<8x128xbf16>, vector<128x128xbf16>, vector<8x128xf32> -> vector<8x128xf32>
    %c0_16 = arith.constant 0 : index
    %c0_17 = arith.constant 0 : index
    %19 = vector.load %arg9[%c0_16, %c0_17] : memref<1x128xf32, #tpu.memory_space<vmem>>, vector<1x128xf32>
    %20 = vector.broadcast %19 : vector<1x128xf32> to vector<8x128xf32>
    %21 = arith.addf %18, %20 : vector<8x128xf32>
    %cst_18 = arith.constant 0.000000e+00 : f32
    %22 = vector.broadcast %cst_18 : f32 to vector<8x128xf32>
    %23 = arith.maximumf %21, %22 : vector<8x128xf32>
    %24 = tpu.iota {dimensions = array<i32: 1>} : vector<8x8xi32>
    %c0_19 = arith.constant 0 : index
    %c0_20 = arith.constant 0 : index
    %25 = vector.load %arg2[%c0_19, %c0_20] : memref<8x1xi32, #tpu.memory_space<vmem>>, vector<8x1xi32>
    %26 = vector.broadcast %25 : vector<8x1xi32> to vector<8x8xi32>
    %27 = arith.cmpi eq, %24, %26 : vector<8x8xi32>
    %28 = tpu.iota {dimensions = array<i32: 1>} : vector<8x8xi32>
    %c0_21 = arith.constant 0 : index
    %c0_22 = arith.constant 0 : index
    %29 = vector.load %arg3[%c0_21, %c0_22] : memref<8x1xi32, #tpu.memory_space<vmem>>, vector<8x1xi32>
    %30 = vector.broadcast %29 : vector<8x1xi32> to vector<8x8xi32>
    %31 = arith.cmpi eq, %28, %30 : vector<8x8xi32>
    %cst_23 = arith.constant 1.000000e+00 : f32
    %cst_24 = arith.constant 0.000000e+00 : f32
    %32 = vector.broadcast %cst_23 : f32 to vector<8x8xf32>
    %33 = vector.broadcast %cst_24 : f32 to vector<8x8xf32>
    %34 = arith.select %27, %32, %33 : vector<8x8xi1>, vector<8x8xf32>
    %35 = arith.truncf %34 : vector<8x8xf32> to vector<8x8xbf16>
    %cst_25 = arith.constant 1.000000e+00 : f32
    %cst_26 = arith.constant 0.000000e+00 : f32
    %36 = vector.broadcast %cst_25 : f32 to vector<8x8xf32>
    %37 = vector.broadcast %cst_26 : f32 to vector<8x8xf32>
    %38 = arith.select %31, %36, %37 : vector<8x8xi1>, vector<8x8xf32>
    %39 = arith.truncf %23 : vector<8x128xf32> to vector<8x128xbf16>
    %cst_27 = arith.constant dense<0.000000e+00> : vector<8x128xf32>
    %40 = tpu.matmul %35, %39, %cst_27 {dimension_numbers = #tpu.dot_dimension_numbers<[1], [0], [0], [1], [0, 0, 1, 1], [], []>} : vector<8x8xbf16>, vector<8x128xbf16>, vector<8x128xf32> -> vector<8x128xf32>
    %cst_28 = arith.constant dense<0.000000e+00> : vector<8x128xf32>
    %41 = tpu.matmul %35, %16, %cst_28 {dimension_numbers = #tpu.dot_dimension_numbers<[1], [0], [0], [1], [0, 0, 1, 1], [], []>} : vector<8x8xbf16>, vector<8x128xbf16>, vector<8x128xf32> -> vector<8x128xf32>
    %cst_29 = arith.constant dense<0.000000e+00> : vector<8x256xf32>
    %42 = tpu.matmul %38, %14, %cst_29 {dimension_numbers = #tpu.dot_dimension_numbers<[1], [0], [0], [1], [0, 0, 1, 1], [], []>} : vector<8x8xf32>, vector<8x256xf32>, vector<8x256xf32> -> vector<8x256xf32>
    %43 = arith.truncf %40 : vector<8x128xf32> to vector<8x128xbf16>
    %c0_30 = arith.constant 0 : index
    %c0_31 = arith.constant 0 : index
    %44 = vector.load %arg10[%c0_30, %c0_31] : memref<128x128xbf16, #tpu.memory_space<vmem>>, vector<128x128xbf16>
    %cst_32 = arith.constant dense<0.000000e+00> : vector<8x128xf32>
    %45 = tpu.matmul %43, %44, %cst_32 {dimension_numbers = #tpu.dot_dimension_numbers<[1], [0], [0], [1], [0, 0, 1, 1], [], []>} : vector<8x128xbf16>, vector<128x128xbf16>, vector<8x128xf32> -> vector<8x128xf32>
    %46 = arith.truncf %41 : vector<8x128xf32> to vector<8x128xbf16>
    %c0_33 = arith.constant 0 : index
    %c0_34 = arith.constant 0 : index
    %47 = vector.load %arg11[%c0_33, %c0_34] : memref<128x128xbf16, #tpu.memory_space<vmem>>, vector<128x128xbf16>
    %cst_35 = arith.constant dense<0.000000e+00> : vector<8x128xf32>
    %48 = tpu.matmul %46, %47, %cst_35 {dimension_numbers = #tpu.dot_dimension_numbers<[1], [0], [0], [1], [0, 0, 1, 1], [], []>} : vector<8x128xbf16>, vector<128x128xbf16>, vector<8x128xf32> -> vector<8x128xf32>
    %49 = arith.addf %45, %48 : vector<8x128xf32>
    %c0_36 = arith.constant 0 : index
    %c0_37 = arith.constant 0 : index
    %50 = vector.load %arg12[%c0_36, %c0_37] : memref<1x128xf32, #tpu.memory_space<vmem>>, vector<1x128xf32>
    %51 = vector.broadcast %50 : vector<1x128xf32> to vector<8x128xf32>
    %52 = arith.addf %49, %51 : vector<8x128xf32>
    %cst_38 = arith.constant 0.000000e+00 : f32
    %53 = vector.broadcast %cst_38 : f32 to vector<8x128xf32>
    %54 = arith.maximumf %52, %53 : vector<8x128xf32>
    %55 = arith.truncf %40 : vector<8x128xf32> to vector<8x128xbf16>
    %c0_39 = arith.constant 0 : index
    %c0_40 = arith.constant 0 : index
    %56 = vector.load %arg13[%c0_39, %c0_40] : memref<128x256xbf16, #tpu.memory_space<vmem>>, vector<128x256xbf16>
    %cst_41 = arith.constant dense<0.000000e+00> : vector<8x256xf32>
    %57 = tpu.matmul %55, %56, %cst_41 {dimension_numbers = #tpu.dot_dimension_numbers<[1], [0], [0], [1], [0, 0, 1, 1], [], []>} : vector<8x128xbf16>, vector<128x256xbf16>, vector<8x256xf32> -> vector<8x256xf32>
    %58 = arith.truncf %54 : vector<8x128xf32> to vector<8x128xbf16>
    %c0_42 = arith.constant 0 : index
    %c0_43 = arith.constant 0 : index
    %59 = vector.load %arg14[%c0_42, %c0_43] : memref<128x256xbf16, #tpu.memory_space<vmem>>, vector<128x256xbf16>
    %cst_44 = arith.constant dense<0.000000e+00> : vector<8x256xf32>
    %60 = tpu.matmul %58, %59, %cst_44 {dimension_numbers = #tpu.dot_dimension_numbers<[1], [0], [0], [1], [0, 0, 1, 1], [], []>} : vector<8x128xbf16>, vector<128x256xbf16>, vector<8x256xf32> -> vector<8x256xf32>
    %61 = arith.addf %57, %60 : vector<8x256xf32>
    %c0_45 = arith.constant 0 : index
    %c0_46 = arith.constant 0 : index
    %62 = vector.load %arg15[%c0_45, %c0_46] : memref<1x256xf32, #tpu.memory_space<vmem>>, vector<1x256xf32>
    %63 = vector.broadcast %62 : vector<1x256xf32> to vector<8x256xf32>
    %64 = arith.addf %61, %63 : vector<8x256xf32>
    %cst_47 = arith.constant dense<0.000000e+00> : vector<8xf32>
    %65 = vector.multi_reduction <add>, %64, %cst_47 [1] : vector<8x256xf32> to vector<8xf32>
    %66 = vector.shape_cast %65 : vector<8xf32> to vector<8x1xf32>
    %cst_48 = arith.constant 2.560000e+02 : f32
    %67 = vector.broadcast %cst_48 : f32 to vector<8x1xf32>
    %68 = arith.divf %66, %67 : vector<8x1xf32>
    %69 = vector.broadcast %68 : vector<8x1xf32> to vector<8x256xf32>
    %70 = arith.subf %64, %69 : vector<8x256xf32>
    %71 = vector.broadcast %68 : vector<8x1xf32> to vector<8x256xf32>
    %72 = arith.subf %64, %71 : vector<8x256xf32>
    %73 = arith.mulf %70, %72 : vector<8x256xf32>
    %cst_49 = arith.constant dense<0.000000e+00> : vector<8xf32>
    %74 = vector.multi_reduction <add>, %73, %cst_49 [1] : vector<8x256xf32> to vector<8xf32>
    %75 = vector.shape_cast %74 : vector<8xf32> to vector<8x1xf32>
    %cst_50 = arith.constant 2.560000e+02 : f32
    %76 = vector.broadcast %cst_50 : f32 to vector<8x1xf32>
    %77 = arith.divf %75, %76 : vector<8x1xf32>
    %78 = vector.broadcast %68 : vector<8x1xf32> to vector<8x256xf32>
    %79 = arith.subf %64, %78 : vector<8x256xf32>
    %cst_51 = arith.constant 9.99999974E-6 : f32
    %80 = vector.broadcast %cst_51 : f32 to vector<8x1xf32>
    %81 = arith.addf %77, %80 : vector<8x1xf32>
    %82 = math.rsqrt %81 : vector<8x1xf32>
    %83 = vector.broadcast %82 : vector<8x1xf32> to vector<8x256xf32>
    %84 = arith.mulf %79, %83 : vector<8x256xf32>
    %c0_52 = arith.constant 0 : index
    %c0_53 = arith.constant 0 : index
    %85 = vector.load %arg16[%c0_52, %c0_53] : memref<1x256xf32, #tpu.memory_space<vmem>>, vector<1x256xf32>
    %86 = vector.broadcast %85 : vector<1x256xf32> to vector<8x256xf32>
    %87 = arith.mulf %84, %86 : vector<8x256xf32>
    %c0_54 = arith.constant 0 : index
    %c0_55 = arith.constant 0 : index
    %88 = vector.load %arg17[%c0_54, %c0_55] : memref<1x256xf32, #tpu.memory_space<vmem>>, vector<1x256xf32>
    %89 = vector.broadcast %88 : vector<1x256xf32> to vector<8x256xf32>
    %90 = arith.addf %87, %89 : vector<8x256xf32>
    %cst_56 = arith.constant 0.000000e+00 : f32
    %91 = vector.broadcast %cst_56 : f32 to vector<8x256xf32>
    %92 = arith.maximumf %90, %91 : vector<8x256xf32>
    %93 = arith.truncf %92 : vector<8x256xf32> to vector<8x256xbf16>
    %c0_57 = arith.constant 0 : index
    %c0_58 = arith.constant 0 : index
    %94 = vector.load %arg18[%c0_57, %c0_58] : memref<256x256xbf16, #tpu.memory_space<vmem>>, vector<256x256xbf16>
    %cst_59 = arith.constant dense<0.000000e+00> : vector<8x256xf32>
    %95 = tpu.matmul %93, %94, %cst_59 {dimension_numbers = #tpu.dot_dimension_numbers<[1], [0], [0], [1], [0, 0, 1, 1], [], []>} : vector<8x256xbf16>, vector<256x256xbf16>, vector<8x256xf32> -> vector<8x256xf32>
    %c0_60 = arith.constant 0 : index
    %c0_61 = arith.constant 0 : index
    %96 = vector.load %arg19[%c0_60, %c0_61] : memref<1x256xf32, #tpu.memory_space<vmem>>, vector<1x256xf32>
    %97 = vector.broadcast %96 : vector<1x256xf32> to vector<8x256xf32>
    %98 = arith.addf %95, %97 : vector<8x256xf32>
    %99 = arith.mulf %98, %42 : vector<8x256xf32>
    %cst_62 = arith.constant dense<0.000000e+00> : vector<8xf32>
    %100 = vector.multi_reduction <add>, %99, %cst_62 [1] : vector<8x256xf32> to vector<8xf32>
    %101 = vector.shape_cast %100 : vector<8xf32> to vector<8x1xf32>
    %102 = arith.mulf %98, %98 : vector<8x256xf32>
    %cst_63 = arith.constant dense<0.000000e+00> : vector<8xf32>
    %103 = vector.multi_reduction <add>, %102, %cst_63 [1] : vector<8x256xf32> to vector<8xf32>
    %104 = vector.shape_cast %103 : vector<8xf32> to vector<8x1xf32>
    %105 = arith.mulf %42, %42 : vector<8x256xf32>
    %cst_64 = arith.constant dense<0.000000e+00> : vector<8xf32>
    %106 = vector.multi_reduction <add>, %105, %cst_64 [1] : vector<8x256xf32> to vector<8xf32>
    %107 = vector.shape_cast %106 : vector<8xf32> to vector<8x1xf32>
    %cst_65 = arith.constant 1.000000e-16 : f32
    %108 = vector.broadcast %cst_65 : f32 to vector<8x1xf32>
    %109 = arith.maximumf %104, %108 : vector<8x1xf32>
    %110 = math.rsqrt %109 : vector<8x1xf32>
    %cst_66 = arith.constant 1.000000e-16 : f32
    %111 = vector.broadcast %cst_66 : f32 to vector<8x1xf32>
    %112 = arith.maximumf %107, %111 : vector<8x1xf32>
    %113 = math.rsqrt %112 : vector<8x1xf32>
    %114 = arith.mulf %110, %113 : vector<8x1xf32>
    %115 = arith.mulf %101, %114 : vector<8x1xf32>
    %116 = vector.shape_cast %115 : vector<8x1xf32> to vector<8x1xf32>
    %117 = vector.broadcast %116 : vector<8x1xf32> to vector<8x128xf32>
    %c0_67 = arith.constant 0 : index
    %c0_68 = arith.constant 0 : index
    %118 = vector.load %arg20[%c0_67, %c0_68] : memref<8x128xf32, #tpu.memory_space<vmem>>, vector<8x128xf32>
    tpu.vector_store %arg20[%c0_67, %c0_68], %117 {strides = array<i32>} : memref<8x128xf32, #tpu.memory_space<vmem>>, vector<8x128xf32>,
    return
  }
}

</mosaic_0001>

<bundles_post_ra>
// kernel: relation_module_forward.1
= control target key start
LH: loop header
LB: loop body
LE: loop exit
PB: predicated region body
PF: predicated region fallthrough
CT: control target
= control target key end

     0   :  { %s2915_s0 = inlined_call_operand.vmem [shape: f32[8,256], index: 0, kind: input, shape index: {}]   ;;  %s2916_s1 = inlined_call_operand.vmem [shape: f32[8,128], index: 1, kind: input, shape index: {}]   ;;  %s2917_s2 = inlined_call_operand.vmem [shape: s32[8,1], index: 2, kind: input, shape index: {}]   ;;  %s2918_s3 = inlined_call_operand.vmem [shape: s32[8,1], index: 3, kind: input, shape index: {}]   ;;  %s2919_s4 = inlined_call_operand.vmem [shape: bf16[256,256], index: 4, kind: input, shape index: {}]   ;;  %s2920_s5 = inlined_call_operand.vmem [shape: f32[1,256], index: 5, kind: input, shape index: {}]   ;;  %s2921_s6 = inlined_call_operand.vmem [shape: bf16[256,256], index: 6, kind: input, shape index: {}]   ;;  %s2922_s7 = inlined_call_operand.vmem [shape: f32[1,256], index: 7, kind: input, shape index: {}]   ;;  %s2923_s8 = inlined_call_operand.vmem [shape: bf16[128,128], index: 8, kind: input, shape index: {}]   ;;  %s2924_s9 = inlined_call_operand.vmem [shape: f32[1,128], index: 9, kind: input, shape index: {}]   ;;  %s2925_s10 = inlined_call_operand.hbm [shape: bf16[128,128], index: 10, kind: input, shape index: {}]   ;;  %s2926_s11 = inlined_call_operand.hbm [shape: bf16[128,128], index: 11, kind: input, shape index: {}]   ;;  %s2927_s12 = inlined_call_operand.vmem [shape: f32[1,128], index: 12, kind: input, shape index: {}]   ;;  %s2928_s13 = inlined_call_operand.vmem [shape: bf16[128,256], index: 13, kind: input, shape index: {}]   ;;  %s2929_s14 = inlined_call_operand.vmem [shape: bf16[128,256], index: 14, kind: input, shape index: {}]   ;;  %s2930_s15 = inlined_call_operand.vmem [shape: f32[1,256], index: 15, kind: input, shape index: {}]   ;;  %s2931_s16 = inlined_call_operand.vmem [shape: f32[1,256], index: 16, kind: input, shape index: {}]   ;;  %s2932_s17 = inlined_call_operand.vmem [shape: f32[1,256], index: 17, kind: input, shape index: {}]   ;;  %s2933_s18 = inlined_call_operand.vmem [shape: bf16[256,256], index: 18, kind: input, shape index: {}]   ;;  %s2934_s19 = inlined_call_operand.vmem [shape: f32[1,256], index: 19, kind: input, shape index: {}]   ;;  %s2935_s20 = inlined_call_operand.vmem [shape: f32[8,128], index: 20, kind: output, shape index: {}]  }
   0x1   :  { %2938 = sst [smem:[#allocation8_spill]] %s2915_s0 }
   0x2   :  { %2939 = sst [smem:[#allocation9_spill]] %s2916_s1 }
   0x3   :  { %2940 = sst [smem:[#allocation10_spill]] %s2917_s2 }
   0x4   :  { %2941 = sst [smem:[#allocation11_spill]] %s2918_s3 }
   0x5   :  { %2942 = sst [smem:[#allocation12_spill]] %s2919_s4 }
   0x6   :  { %25 = vsyncpa [#allocation3], 0 }
   0x7   :  { %26 = vsyncpa [#allocation5], 0  ;;  %s2255_s1 = smov [#allocation2]   ;;  %s2207_s2 = scalar_lea.hbm %s2925_s10, 1024 }
   0x8   :  { %s52_s22 = sshll.u32 %s2255_s1, 4  ;;  %p2208_p0 = scmp.ne.s32.totalorder %s2925_s10, %s2207_s2  ;;  %s53_s22 = int_to_ptr.vmem [resolvable:$true] %s52_s22 }
   0x9   :  { %p2211_p1 = scmp.lt.u32.totalorder %s2207_s2, %s2925_s10 }
   0xb   :  { %p2213_p2 = pnand %p2211_p1, %p2208_p0 }
   0xd   :  { %2216 = shalt.err (!%p2213_p2)
}
   0xe   :  { %s2217_s28 = scalar_lea.vmem %s53_s22, 1024  ;;  %p2222_p4 = scmp.lt.s32.totalorder %s53_s22, %s53_s22 }
   0xf   :  { %p2218_p3 = scmp.ne.s32.totalorder %s53_s22, %s2217_s28  ;;  %p2223_p5 = scmp.lt.s32.totalorder %s2217_s28, %s2217_s28 }
  0x11   :  { %p2224_p6 = por %p2223_p5, %p2222_p4 }
  0x13   :  { %p2225_p7 = pnand %p2224_p6, %p2218_p3 }
  0x15   :  { %2228 = shalt.err (!%p2225_p7)
}
  0x16   :  { %s2256_s4 = smov 64   ;;  %s2257_s29 = smov 4  }
  0x17   :  { %58 = dma.hbm_to_vmem [thread:$0]  %s2925_s10, 1024, %s53_s22, [#allocation3], %s2256_s4, %s2256_s4, %s2257_s29  }
  0x18   :  { %s2258_s21 = smov [#allocation4]   ;;  %s2229_s2 = scalar_lea.hbm %s2926_s11, 1024 }
  0x19   :  { %s64_s1 = sshll.u32 %s2258_s21, 4  ;;  %p2230_p8 = scmp.ne.s32.totalorder %s2926_s11, %s2229_s2  ;;  %s65_s1 = int_to_ptr.vmem [resolvable:$true] %s64_s1 }
  0x1a   :  { %p2233_p9 = scmp.lt.u32.totalorder %s2229_s2, %s2926_s11 }
  0x1c   :  { %p2235_p10 = pnand %p2233_p9, %p2230_p8 }
  0x1e   :  { %2238 = shalt.err (!%p2235_p10)
}
  0x1f   :  { %s2239_s28 = scalar_lea.vmem %s65_s1, 1024  ;;  %p2244_p12 = scmp.lt.s32.totalorder %s65_s1, %s65_s1 }
  0x20   :  { %p2240_p11 = scmp.ne.s32.totalorder %s65_s1, %s2239_s28  ;;  %p2245_p13 = scmp.lt.s32.totalorder %s2239_s28, %s2239_s28 }
  0x22   :  { %p2246_p0 = por %p2245_p13, %p2244_p12 }
  0x24   :  { %p2247_p1 = pnand %p2246_p0, %p2240_p11 }
  0x26   :  { %2250 = shalt.err (!%p2247_p1)
}
  0x27   :  { %70 = dma.hbm_to_vmem [thread:$0]  %s2926_s11, 1024, %s65_s1, [#allocation5], %s2256_s4, %s2256_s4, %s2257_s29  }
  0x28   :  { %2251 = dma.done.wait [#allocation3], 1024  }
  0x29   :  { %2252 = vsyncadd [#allocation3], 4294966272 }
  0x2a   :  { %2253 = dma.done.wait [#allocation5], 1024  }
  0x2b   :  { %2254 = vsyncadd [#allocation5], 4294966272  ;;  %v2259_v0 = vmov 0   ;;  %s2943_s21 = sld [smem:[#allocation12_spill]]  ;;  %s2944_s27 = sld [smem:[#allocation8_spill]]  ;;  %v2033_v56 = vld [vmem:[%s2923_s8] sm:$0xff]  }
  0x2c   :  { %1984 = vset.pattern.permute.xlu0 %v2259_v0  ;;  %s2945_s26 = sld [smem:[#allocation10_spill]]  ;;  %s2946_s22 = sld [smem:[#allocation11_spill]]  ;;  %v2041_v24 = vld [vmem:[%s2921_s6 + $0x4] ss:$8 sps:$4 sm:$0xff]   ;;  %v2043_v25 = vld [vmem:[%s2921_s6] ss:$8 sps:$4 sm:$0xff]  }
  0x2d   :  { %551 = vmatprep.subr.bf16.mxu1 %v2041_v24  ;;  %v2044_v26 = vld [vmem:[%s2921_s6 + $0x14] ss:$8 sps:$4 sm:$0xff]   ;;  %v2046_v28 = vld [vmem:[%s2921_s6 + $0x10] ss:$8 sps:$4 sm:$0xff]   ;;  %v2047_v29 = vld [vmem:[%s2921_s6 + $0x24] ss:$8 sps:$4 sm:$0xff]  }
  0x2e   :  { %552 = vmatpush1.bf16.msra.mxu1 %v2043_v25  ;;  %v2049_v32 = vld [vmem:[%s2921_s6 + $0x20] ss:$8 sps:$4 sm:$0xff]   ;;  %v2050_v33 = vld [vmem:[%s2921_s6 + $0x34] ss:$8 sps:$4 sm:$0xff]   ;;  %v2052_v36 = vld [vmem:[%s2921_s6 + $0x30] ss:$8 sps:$4 sm:$0xff]  }
  0x2f   :  { %553 = vmatprep.subr.bf16.mxu1 %v2044_v26  ;;  %v2053_v37 = vld [vmem:[%s2921_s6 + $0x44] ss:$8 sps:$4 sm:$0xff]   ;;  %v2055_v40 = vld [vmem:[%s2921_s6 + $0x40] ss:$8 sps:$4 sm:$0xff]   ;;  %v2056_v41 = vld [vmem:[%s2921_s6 + $0x54] ss:$8 sps:$4 sm:$0xff]  }
  0x30   :  { %v2058_v44 = vld [vmem:[%s2921_s6 + $0x50] ss:$8 sps:$4 sm:$0xff]   ;;  %v2059_v45 = vld [vmem:[%s2921_s6 + $0x64] ss:$8 sps:$4 sm:$0xff]   ;;  %v2061_v47 = vld [vmem:[%s2921_s6 + $0x60] ss:$8 sps:$4 sm:$0xff]  }
  0x31   :  { %v1985_v1 = vld [vmem:[%s2943_s21 + $0x4] ss:$8 sps:$4 sm:$0xff]   ;;  %v1987_v2 = vld [vmem:[%s2943_s21] ss:$8 sps:$4 sm:$0xff]   ;;  %v1988_v3 = vld [vmem:[%s2943_s21 + $0x14] ss:$8 sps:$4 sm:$0xff]  }
  0x32   :  { %302 = vmatprep.subr.bf16.mxu0 %v1985_v1  ;;  %v1990_v4 = vld [vmem:[%s2943_s21 + $0x10] ss:$8 sps:$4 sm:$0xff]   ;;  %v1991_v5 = vld [vmem:[%s2943_s21 + $0x24] ss:$8 sps:$4 sm:$0xff]   ;;  %v1993_v6 = vld [vmem:[%s2943_s21 + $0x20] ss:$8 sps:$4 sm:$0xff]   ;;  %554 = vmatpush1.bf16.msra.mxu1 %v2046_v28 }
  0x33   :  { %303 = vmatpush1.bf16.msra.mxu0 %v1987_v2  ;;  %v1994_v7 = vld [vmem:[%s2943_s21 + $0x34] ss:$8 sps:$4 sm:$0xff]   ;;  %v1996_v8 = vld [vmem:[%s2943_s21 + $0x30] ss:$8 sps:$4 sm:$0xff]   ;;  %v1997_v9 = vld [vmem:[%s2943_s21 + $0x44] ss:$8 sps:$4 sm:$0xff]   ;;  %555 = vmatprep.subr.bf16.mxu1 %v2047_v29 }
  0x34   :  { %304 = vmatprep.subr.bf16.mxu0 %v1988_v3  ;;  %v1999_v10 = vld [vmem:[%s2943_s21 + $0x40] ss:$8 sps:$4 sm:$0xff]   ;;  %v2000_v11 = vld [vmem:[%s2943_s21 + $0x54] ss:$8 sps:$4 sm:$0xff]   ;;  %v2002_v12 = vld [vmem:[%s2943_s21 + $0x50] ss:$8 sps:$4 sm:$0xff]  }
  0x35   :  { %v2003_v13 = vld [vmem:[%s2943_s21 + $0x64] ss:$8 sps:$4 sm:$0xff]   ;;  %v2005_v16 = vld [vmem:[%s2943_s21 + $0x60] ss:$8 sps:$4 sm:$0xff]   ;;  %v2006_v17 = vld [vmem:[%s2943_s21 + $0x74] ss:$8 sps:$4 sm:$0xff]  }
  0x36   :  { %v95_v14 = vld [vmem:[%s2944_s27 + $0x8] sm:$0xff]  ;;  %v2008_v18 = vld [vmem:[%s2943_s21 + $0x70] ss:$8 sps:$4 sm:$0xff]   ;;  %v2012_v21 = vld [vmem:[%s2943_s21 + $0x94] ss:$8 sps:$4 sm:$0xff]   ;;  %556 = vmatpush1.bf16.msra.mxu1 %v2049_v32  ;;  %v2260_v59 = vmov 0.0  }
  0x37   :  { %305 = vmatpush1.bf16.msra.mxu0 %v1990_v4  ;;  %v97_v15 = vpack.c.bf16 %v95_v14, %v95_v14  ;;  %v2009_v19 = vld [vmem:[%s2943_s21 + $0x84] ss:$8 sps:$4 sm:$0xff]   ;;  %v2011_v20 = vld [vmem:[%s2943_s21 + $0x80] ss:$8 sps:$4 sm:$0xff]   ;;  %v2014_v27 = vld [vmem:[%s2943_s21 + $0x90] ss:$8 sps:$4 sm:$0xff]   ;;  %557 = vmatprep.subr.bf16.mxu1 %v2050_v33 }
  0x38   :  { %306 = vmatprep.subr.bf16.mxu0 %v1991_v5  ;;  %v708_v22 = vld [vmem:[%s2945_s26] sm:$0xff]  ;;  %v2018_v34 = vld [vmem:[%s2943_s21 + $0xb4] ss:$8 sps:$4 sm:$0xff]   ;;  %v2020_v35 = vld [vmem:[%s2943_s21 + $0xb0] ss:$8 sps:$4 sm:$0xff]   ;;  %vm2261_vm0 = vmmov 0  }
  0x39   :  { %334 = vmatprep.mubr.bf16.mxu0 %v97_v15  ;;  %v713_v23 = vld [vmem:[%s2946_s22] sm:$0xff]  ;;  %710 = vperm.xlu0 %1984, %v708_v22   ;;  %v2024_v42 = vld [vmem:[%s2943_s21 + $0xd4] ss:$8 sps:$4 sm:$0xff]   ;;  %v2026_v43 = vld [vmem:[%s2943_s21 + $0xd0] ss:$8 sps:$4 sm:$0xff]   ;;  %s2947_s11 = sld [smem:[#allocation9_spill]] }
  0x3a   :  { %v2015_v30 = vld [vmem:[%s2943_s21 + $0xa4] ss:$8 sps:$4 sm:$0xff]   ;;  %v2017_v31 = vld [vmem:[%s2943_s21 + $0xa0] ss:$8 sps:$4 sm:$0xff]   ;;  %558 = vmatpush1.bf16.msra.mxu1 %v2052_v36  ;;  %v2062_v49 = vld [vmem:[%s2921_s6 + $0x74] ss:$8 sps:$4 sm:$0xff]  }
  0x3b   :  { %307 = vmatpush1.bf16.msra.mxu0 %v1993_v6  ;;  %v2021_v38 = vld [vmem:[%s2943_s21 + $0xc4] ss:$8 sps:$4 sm:$0xff]   ;;  %v2023_v39 = vld [vmem:[%s2943_s21 + $0xc0] ss:$8 sps:$4 sm:$0xff]   ;;  %559 = vmatprep.subr.bf16.mxu1 %v2053_v37  ;;  %v2030_v50 = vld [vmem:[%s2943_s21 + $0xf4] ss:$8 sps:$4 sm:$0xff]  }
  0x3c   :  { %308 = vmatprep.subr.bf16.mxu0 %v1994_v7  ;;  %v2027_v46 = vld [vmem:[%s2943_s21 + $0xe4] ss:$8 sps:$4 sm:$0xff]   ;;  %v2029_v48 = vld [vmem:[%s2943_s21 + $0xe0] ss:$8 sps:$4 sm:$0xff]   ;;  %v2064_v51 = vld [vmem:[%s2921_s6 + $0x70] ss:$8 sps:$4 sm:$0xff]  }
  0x3d   :  { %715 = vperm.xlu0 %1984, %v713_v23   ;;  %v2032_v52 = vld [vmem:[%s2943_s21 + $0xf0] ss:$8 sps:$4 sm:$0xff]   ;;  %v94_v53 = vld [vmem:[%s2944_s27] sm:$0xff]  ;;  %v2068_v58 = vld [vmem:[%s2921_s6 + $0x94] ss:$8 sps:$4 sm:$0xff]   ;;  %vm726_vm2 = vcmask 1043456  }
  0x3e   :  { %560 = vmatpush1.bf16.msra.mxu1 %v2055_v40  ;;  %v2065_v54 = vld [vmem:[%s2921_s6 + $0x84] ss:$8 sps:$4 sm:$0xff]   ;;  %v2067_v55 = vld [vmem:[%s2921_s6 + $0x80] ss:$8 sps:$4 sm:$0xff]   ;;  %v96_v57 = vpack.c.bf16 %v94_v53, %v94_v53  ;;  %v2070_v60 = vld [vmem:[%s2921_s6 + $0x90] ss:$8 sps:$4 sm:$0xff]  }
  0x3f   :  { %309 = vmatpush1.bf16.msra.mxu0 %v1996_v8  ;;  %561 = vmatprep.subr.bf16.mxu1 %v2056_v41  ;;  %v2034_v61 = vld [vmem:[%s2923_s8 + $0x8] sm:$0xff]   ;;  %v2035_v1 = vld [vmem:[%s2923_s8 + $0x10] sm:$0xff]   ;;  %v2036_v4 = vld [vmem:[%s2923_s8 + $0x18] sm:$0xff]   ;;  %vm722_vm3 = vcmask 64512  }
  0x40   :  { %310 = vmatprep.subr.bf16.mxu0 %v1997_v9  ;;  %v2071_v62 = vld [vmem:[%s2921_s6 + $0xa4] ss:$8 sps:$4 sm:$0xff]   ;;  %v2073_v63 = vld [vmem:[%s2921_s6 + $0xa0] ss:$8 sps:$4 sm:$0xff]   ;;  %v2074_v2 = vld [vmem:[%s2921_s6 + $0xb4] ss:$8 sps:$4 sm:$0xff]  }
  0x41   :  { %v2076_v3 = vld [vmem:[%s2921_s6 + $0xb0] ss:$8 sps:$4 sm:$0xff]   ;;  %v2077_v5 = vld [vmem:[%s2921_s6 + $0xc4] ss:$8 sps:$4 sm:$0xff]   ;;  %v2079_v6 = vld [vmem:[%s2921_s6 + $0xc0] ss:$8 sps:$4 sm:$0xff]  }
  0x42   :  { %562 = vmatpush1.bf16.msra.mxu1 %v2058_v44  ;;  %v2037_v7 = vld [vmem:[%s2923_s8 + $0x20] sm:$0xff]   ;;  %v2080_v8 = vld [vmem:[%s2921_s6 + $0xd4] ss:$8 sps:$4 sm:$0xff]   ;;  %v2082_v9 = vld [vmem:[%s2921_s6 + $0xd0] ss:$8 sps:$4 sm:$0xff]  }
  0x43   :  { %311 = vmatpush1.bf16.msra.mxu0 %v1999_v10  ;;  %563 = vmatprep.subr.bf16.mxu1 %v2059_v45  ;;  %v2038_v10 = vld [vmem:[%s2923_s8 + $0x28] sm:$0xff]   ;;  %v130_v22 = vld [vmem:[%s2920_s5] sm:$0x3]  ;;  %v2092_v53 = vld [vmem:[#allocation4 + $0x18] sm:$0xff]  }
  0x44   :  { %312 = vmatprep.subr.bf16.mxu0 %v2000_v11  ;;  %v2039_v11 = vld [vmem:[%s2923_s8 + $0x30] sm:$0xff]   ;;  %v2083_v15 = vld [vmem:[%s2921_s6 + $0xe4] ss:$8 sps:$4 sm:$0xff]   ;;  %v1781_v37 = vld [vmem:[%s2924_s9] ss:$0 sm:$0xff] }
  0x46   :  { %564 = vmatpush1.bf16.msra.mxu1 %v2061_v47 }
  0x47   :  { %313 = vmatpush1.bf16.msra.mxu0 %v2002_v12  ;;  %565 = vmatprep.subr.bf16.mxu1 %v2062_v49  ;;  %v2040_v12 = vld [vmem:[%s2923_s8 + $0x38] sm:$0xff]  }
  0x48   :  { %314 = vmatprep.subr.bf16.mxu0 %v2003_v13  ;;  %v592_v13 = vld [vmem:[%s2947_s11] sm:$0xff] }
  0x49   :  { %v593_v14 = vpack.c.bf16 %v592_v13, %v592_v13 }
  0x4a   :  { %566 = vmatpush1.bf16.msra.mxu1 %v2064_v51  ;;  %v2090_v51 = vld [vmem:[#allocation4 + $0x8] sm:$0xff]  }
  0x4b   :  { %315 = vmatpush1.bf16.msra.mxu0 %v2005_v16  ;;  %567 = vmatprep.subr.bf16.mxu1 %v2065_v54  ;;  %v2085_v16 = vld [vmem:[%s2921_s6 + $0xe0] ss:$8 sps:$4 sm:$0xff]   ;;  %v771_v49 = vsel %vm726_vm2, %v593_v14, 0 }
  0x4c   :  { %316 = vmatprep.subr.bf16.mxu0 %v2006_v17  ;;  %v2086_v17 = vld [vmem:[%s2921_s6 + $0xf4] ss:$8 sps:$4 sm:$0xff]   ;;  %v2093_v54 = vld [vmem:[#allocation4 + $0x20] sm:$0xff]  }
  0x4e   :  { %568 = vmatpush1.bf16.msra.mxu1 %v2067_v55  ;;  %v2094_v55 = vld [vmem:[#allocation4 + $0x28] sm:$0xff]  }
  0x4f   :  { %317 = vmatpush1.bf16.msra.mxu0 %v2008_v18  ;;  %569 = vmatprep.subr.bf16.mxu1 %v2068_v58  ;;  %v2088_v18 = vld [vmem:[%s2921_s6 + $0xf0] ss:$8 sps:$4 sm:$0xff]   ;;  %v379_v58 = vld [vmem:[%s2922_s7] sm:$0x3] }
  0x50   :  { %318 = vmatprep.subr.bf16.mxu0 %v2009_v19  ;;  %v132_v19 = vlaneseq }
  0x52   :  { %570 = vmatpush1.bf16.msra.mxu1 %v2070_v60  ;;  %v707_v36 = vand.u32 127, %v132_v19 }
  0x53   :  { %319 = vmatpush1.bf16.msra.mxu0 %v2011_v20  ;;  %571 = vmatprep.subr.bf16.mxu1 %v2071_v62  ;;  %v133_v20 = vshrl.u32 %v132_v19, 7  ;;  %v2100_v19 = vld [vmem:[#allocation2 + $0x18] sm:$0xff]  }
  0x54   :  { %320 = vmatprep.subr.bf16.mxu0 %v2012_v21 }
  0x55   :  { %v2637_v21 = vsub.s32 0, %v133_v20  ;;  %v2642_v23 = vsub.s32 1, %v133_v20  ;;  %v2101_v20 = vld [vmem:[#allocation2 + $0x20] sm:$0xff]  }
  0x56   :  { %572 = vmatpush1.bf16.msra.mxu1 %v2073_v63 }
  0x57   :  { %321 = vmatpush1.bf16.msra.mxu0 %v2014_v27  ;;  %573 = vmatprep.subr.bf16.mxu1 %v2074_v2  ;;  %v135_v24 = vrot.slane %v130_v22, %v2637_v21  ;;  %v139_v25 = vrot.slane %v130_v22, %v2642_v23  ;;  %v388_v60 = vrot.slane %v379_v58, %v2642_v23  ;;  %v2102_v22 = vld [vmem:[#allocation2 + $0x28] sm:$0xff]  }
  0x58   :  { %322 = vmatprep.subr.bf16.mxu0 %v2015_v30  ;;  %v384_v62 = vrot.slane %v379_v58, %v2637_v21 }
  0x5a   :  { %574 = vmatpush1.bf16.msra.mxu1 %v2076_v3 }
  0x5b   :  { %323 = vmatpush1.bf16.msra.mxu0 %v2017_v31  ;;  %575 = vmatprep.subr.bf16.mxu1 %v2077_v5 }
  0x5c   :  { %324 = vmatprep.subr.bf16.mxu0 %v2018_v34 }
  0x5e   :  { %576 = vmatpush1.bf16.msra.mxu1 %v2079_v6 }
  0x5f   :  { %325 = vmatpush1.bf16.msra.mxu0 %v2020_v35  ;;  %577 = vmatprep.subr.bf16.mxu1 %v2080_v8 }
  0x60   :  { %326 = vmatprep.subr.bf16.mxu0 %v2021_v38 }
  0x62   :  { %578 = vmatpush1.bf16.msra.mxu1 %v2082_v9 }
  0x63   :  { %327 = vmatpush1.bf16.msra.mxu0 %v2023_v39  ;;  %579 = vmatprep.subr.bf16.mxu1 %v2083_v15 }
  0x64   :  { %328 = vmatprep.subr.bf16.mxu0 %v2024_v42 }
  0x66   :  { %580 = vmatpush1.bf16.msra.mxu1 %v2085_v16 }
  0x67   :  { %329 = vmatpush1.bf16.msra.mxu0 %v2026_v43  ;;  %581 = vmatprep.subr.bf16.mxu1 %v2086_v17  ;;  %v2098_v17 = vld [vmem:[#allocation2 + $0x8] sm:$0xff]  }
  0x68   :  { %330 = vmatprep.subr.bf16.mxu0 %v2027_v46 }
  0x6a   :  { %582 = vmatpush1.bf16.msra.mxu1 %v2088_v18  ;;  %v2099_v18 = vld [vmem:[#allocation2 + $0x10] sm:$0xff]  }
  0x6b   :  { %331 = vmatpush1.bf16.msra.mxu0 %v2029_v48  ;;  %1925 = vmatprep.subr.bf16.mxu1 %v2260_v59 }
  0x6c   :  { %332 = vmatprep.subr.bf16.mxu0 %v2030_v50  ;;  %v2089_v50 = vld [vmem:[#allocation4] sm:$0xff]  }
  0x6f   :  { %333 = vmatpush1.bf16.msra.mxu0 %v2032_v52  ;;  %v2091_v52 = vld [vmem:[#allocation4 + $0x10] sm:$0xff]  }
  0x70   :  { %1905 = vmatprep.subr.bf16.mxu0 %v2260_v59 }
  0x72   :  { %335 = vmatmul.mubr.bf16.vlgmr.msra.gmra.mrb[0].mxu0 %v96_v57  ;;  %v2096_v57 = vld [vmem:[#allocation4 + $0x38] sm:$0xff]  }
  0x73   :  { %1906 = vmatpush3.bf16.msra.mxu0 %v2033_v56  ;;  %1921 = vmatprep.mubr.msk.bf16.mxu0 %vm2261_vm0, %v2260_v59  ;;  %v2095_v56 = vld [vmem:[#allocation4 + $0x30] sm:$0xff]  }
  0x74   :  { %1907 = vmatprep.subr.bf16.mxu0 %v2260_v59 }
  0x77   :  { %1908 = vmatpush3.bf16.msra.mxu0 %v2034_v61 }
  0x78   :  { %1909 = vmatprep.subr.bf16.mxu0 %v2260_v59 }
  0x7b   :  { %1910 = vmatpush3.bf16.msra.mxu0 %v2035_v1 }
  0x7c   :  { %1911 = vmatprep.subr.bf16.mxu0 %v2260_v59 }
  0x7f   :  { %1912 = vmatpush3.bf16.msra.mxu0 %v2036_v4 }
  0x80   :  { %1913 = vmatprep.subr.bf16.mxu0 %v2260_v59 }
  0x83   :  { %1914 = vmatpush3.bf16.msra.mxu0 %v2037_v7 }
  0x84   :  { %1915 = vmatprep.subr.bf16.mxu0 %v2260_v59 }
  0x87   :  { %1916 = vmatpush3.bf16.msra.mxu0 %v2038_v10 }
  0x88   :  { %1917 = vmatprep.subr.bf16.mxu0 %v2260_v59 }
  0x8b   :  { %1918 = vmatpush3.bf16.msra.mxu0 %v2039_v11 }
  0x8c   :  { %1919 = vmatprep.subr.bf16.mxu0 %v2260_v59 }
  0x8f   :  { %1920 = vmatpush3.bf16.msra.mxu0 %v2040_v12  ;;  %v2097_v12 = vld [vmem:[#allocation2] sm:$0xff]  }
  0x90   :  { %1937 = vmatprep.subr.bf16.mxu0 %v2260_v59 }
  0x92   :  { %1922 = vmatmul.mubr.bf16.vlgmr.msra.gmra.mrb[4].mxu0 %v593_v14 }
  0x93   :  { %1953 = vmatprep.mubr.msk.bf16.mxu0 %vm2261_vm0, %v2260_v59  ;;  %1938 = vmatpush3.bf16.msra.mxu0 %v2089_v50  ;;  %v2141_v50 = vld [vmem:[%s2929_s14 + $0x40] ss:$8 sps:$4 sm:$0xff]  }
  0x94   :  { %1939 = vmatprep.subr.bf16.mxu0 %v2260_v59 }
  0x97   :  { %1940 = vmatpush3.bf16.msra.mxu0 %v2090_v51  ;;  %v2146_v51 = vld [vmem:[%s2929_s14 + $0x54] ss:$8 sps:$4 sm:$0xff]  }
  0x98   :  { %1941 = vmatprep.subr.bf16.mxu0 %v2260_v59 }
  0x9b   :  { %1942 = vmatpush3.bf16.msra.mxu0 %v2091_v52  ;;  %v2144_v52 = vld [vmem:[%s2929_s14 + $0x50] ss:$8 sps:$4 sm:$0xff]  }
  0x9c   :  { %1943 = vmatprep.subr.bf16.mxu0 %v2260_v59 }
  0x9f   :  { %1944 = vmatpush3.bf16.msra.mxu0 %v2092_v53  ;;  %v2149_v53 = vld [vmem:[%s2929_s14 + $0x64] ss:$8 sps:$4 sm:$0xff]  }
  0xa0   :  { %1945 = vmatprep.subr.bf16.mxu0 %v2260_v59 }
  0xa3   :  { %1946 = vmatpush3.bf16.msra.mxu0 %v2093_v54  ;;  %v2147_v54 = vld [vmem:[%s2929_s14 + $0x60] ss:$8 sps:$4 sm:$0xff]  }
  0xa4   :  { %1947 = vmatprep.subr.bf16.mxu0 %v2260_v59 }
  0xa7   :  { %1948 = vmatpush3.bf16.msra.mxu0 %v2094_v55  ;;  %v2152_v55 = vld [vmem:[%s2929_s14 + $0x74] ss:$8 sps:$4 sm:$0xff]  }
  0xa8   :  { %1949 = vmatprep.subr.bf16.mxu0 %v2260_v59 }
  0xab   :  { %1950 = vmatpush3.bf16.msra.mxu0 %v2095_v56  ;;  %v2150_v56 = vld [vmem:[%s2929_s14 + $0x70] ss:$8 sps:$4 sm:$0xff]  }
  0xac   :  { %1951 = vmatprep.subr.bf16.mxu0 %v2260_v59 }
  0xaf   :  { %1952 = vmatpush3.bf16.msra.mxu0 %v2096_v57 }
  0xb0   :  { %1957 = vmatprep.subr.bf16.mxu0 %v2260_v59 }
  0xb8   :  { %v711_v39 = vpop.permute.xlu0 %710 }
  0xb9   :  { %vm712_vm1 = vcmp.eq.s32.totalorder %v707_v36, %v711_v39  ;;  %v2128_v39 = vld [vmem:[%s2928_s13 + $0x74] ss:$8 sps:$4 sm:$0xff]  }
  0xba   :  { %v718_v45 = vsel %vm712_vm1, 1.0, %v2260_v59 }
  0xbb   :  { %v719_v47 = vpack.c.bf16 %v718_v45, %v718_v45  ;;  %v2137_v45 = vld [vmem:[%s2929_s14 + $0x24] ss:$8 sps:$4 sm:$0xff]  }
  0xbc   :  { %v716_v61 = vpop.permute.xlu0 %715 }
  0xbd   :  { %vm717_vm4 = vcmp.eq.s32.totalorder %v707_v36, %v716_v61  ;;  %v2120_v36 = vld [vmem:[%s2928_s13 + $0x50] ss:$8 sps:$4 sm:$0xff]  }
  0xbe   :  { %v720_v6 = vsel %vm717_vm4, 1.0, %v2260_v59 }
 0x145   :  { %v336_v26 = vpop.f32.mrb[0].mxu0 }
 0x146   :  { %v337_v27 = vadd.f32 %v336_v26, %v135_v24  ;;  %v338_v28 = vpop.f32.mrb[1].mxu0  ;;  %v2103_v24 = vld [vmem:[#allocation2 + $0x30] sm:$0xff]   ;;  %v2107_v26 = vld [vmem:[%s2928_s13 + $0x4] ss:$8 sps:$4 sm:$0xff]  }
 0x147   :  { %v339_v29 = vadd.f32 %v338_v28, %v139_v25  ;;  %v340_v30 = vpop.f32.mrb[2].mxu0  ;;  %v2104_v25 = vld [vmem:[#allocation2 + $0x38] sm:$0xff]  }
 0x148   :  { %v343_v31 = vmax.f32 %v337_v27, 0.0  ;;  %v341_v32 = vpop.f32.mrb[3].mxu0  ;;  %v2105_v27 = vld [vmem:[%s2928_s13] ss:$8 sps:$4 sm:$0xff]   ;;  %v2113_v30 = vld [vmem:[%s2928_s13 + $0x24] ss:$8 sps:$4 sm:$0xff]  }
 0x149   :  { %v344_v33 = vmax.f32 %v339_v29, 0.0  ;;  %v2110_v29 = vld [vmem:[%s2928_s13 + $0x14] ss:$8 sps:$4 sm:$0xff]  }
 0x14a   :  { %v345_v34 = vpack.c.bf16 %v343_v31, %v343_v31  ;;  %v2111_v31 = vld [vmem:[%s2928_s13 + $0x20] ss:$8 sps:$4 sm:$0xff]   ;;  %v2116_v32 = vld [vmem:[%s2928_s13 + $0x34] ss:$8 sps:$4 sm:$0xff]  }
 0x14b   :  { %v346_v35 = vpack.c.bf16 %v344_v33, %v344_v33  ;;  %v2119_v33 = vld [vmem:[%s2928_s13 + $0x44] ss:$8 sps:$4 sm:$0xff]  }
 0x14d   :  { %583 = vmatprep.mubr.bf16.mxu1 %v346_v35  ;;  %v2122_v35 = vld [vmem:[%s2928_s13 + $0x54] ss:$8 sps:$4 sm:$0xff]  }
 0x14e   :  { %584 = vmatmul.mubr.bf16.vlgmr.msra.gmra.mrb[0].mxu1 %v345_v34  ;;  %v2117_v34 = vld [vmem:[%s2928_s13 + $0x40] ss:$8 sps:$4 sm:$0xff]  }
 0x14f   :  { %1927 = vmatprep.mubr.msk.bf16.mxu1 %vm2261_vm0, %v2260_v59 }
 0x165   :  { %v699_v38 = vpop.f32.mrb[4].mxu0 }
 0x166   :  { %v700_v40 = vadd.f32 %v1781_v37, %v699_v38  ;;  %v1923_v41 = vpop.f32.mrb[5].mxu0  ;;  %v2125_v37 = vld [vmem:[%s2928_s13 + $0x64] ss:$8 sps:$4 sm:$0xff]   ;;  %v2123_v38 = vld [vmem:[%s2928_s13 + $0x60] ss:$8 sps:$4 sm:$0xff]  }
 0x167   :  { %v702_v42 = vpop.f32.mrb[6].mxu0  ;;  %v2129_v41 = vld [vmem:[%s2929_s14] ss:$8 sps:$4 sm:$0xff]  }
 0x168   :  { %v705_v43 = vmax.f32 %v700_v40, 0.0  ;;  %v1924_v44 = vpop.f32.mrb[7].mxu0  ;;  %v2126_v40 = vld [vmem:[%s2928_s13 + $0x70] ss:$8 sps:$4 sm:$0xff]   ;;  %v2131_v42 = vld [vmem:[%s2929_s14 + $0x4] ss:$8 sps:$4 sm:$0xff]  }
 0x169   :  { %v2132_v44 = vld [vmem:[%s2929_s14 + $0x10] ss:$8 sps:$4 sm:$0xff]  }
 0x16a   :  { %v721_v46 = vpack.c.bf16 %v705_v43, %v705_v43  ;;  %v2134_v43 = vld [vmem:[%s2929_s14 + $0x14] ss:$8 sps:$4 sm:$0xff]  }
 0x16c   :  { %v728_v48 = vsel %vm726_vm2, %v721_v46, 0  ;;  %v2135_v46 = vld [vmem:[%s2929_s14 + $0x20] ss:$8 sps:$4 sm:$0xff]  }
 0x16d   :  { %1926 = vmatpush3.bf16.msra.mxu1 %v728_v48  ;;  %v2138_v48 = vld [vmem:[%s2929_s14 + $0x30] ss:$8 sps:$4 sm:$0xff]  }
 0x16e   :  { %1931 = vmatprep.subr.bf16.mxu1 %v2260_v59 }
 0x170   :  { %1928 = vmatmul.mubr.msk.bf16.vlgmr.msra.gmra.mrb[4].mxu1 %vm722_vm3, %v719_v47 }
 0x171   :  { %1932 = vmatpush3.bf16.msra.mxu1 %v771_v49  ;;  %1933 = vmatprep.mubr.msk.bf16.mxu1 %vm2261_vm0, %v2260_v59  ;;  %v2143_v49 = vld [vmem:[%s2929_s14 + $0x44] ss:$8 sps:$4 sm:$0xff]  }
 0x178   :  { %1934 = vmatmul.mubr.msk.bf16.vlgmr.msra.gmra.mrb[8].mxu1 %vm722_vm3, %v719_v47  ;;  %v2140_v47 = vld [vmem:[%s2929_s14 + $0x34] ss:$8 sps:$4 sm:$0xff]  }
 0x179   :  { %880 = vmatprep.mubr.f32.mxu1 %v2260_v59 }
 0x221   :  { %v585_v63 = vpop.f32.mrb[0].mxu1 }
 0x222   :  { %v587_v1 = vpop.f32.mrb[1].mxu1  ;;  %v586_v4 = vadd.f32 %v585_v63, %v384_v62 }
 0x223   :  { %v588_v2 = vadd.f32 %v587_v1, %v388_v60  ;;  %v589_v3 = vpop.f32.mrb[2].mxu1 }
 0x224   :  { %v590_v5 = vpop.f32.mrb[3].mxu1 }
 0x225   :  { %816 = vmatprep.subr.mxu1 %v588_v2  ;;  %v1809_v5 = vld [vmem:[%s2927_s12] ss:$0 sm:$0xff] }
 0x226   :  { %817 = vmatpush1.msra.mxu1 %v586_v4 }
 0x227   :  { %1792 = vmatmul.mubr.msk.f32.vlgmr.msra.gmra.mrb[12].mxu1 %vm722_vm3, %v720_v6  ;;  %1219 = vmatprep.subr.bf16.mxu1 %v2131_v42  ;;  %v2171_v42 = vld [vmem:[%s2933_s18 + $0x60] ss:$8 sps:$4 sm:$0xff]  }
 0x228   :  { %1251 = vmatprep.mubr.bf16.mxu1 %v2259_v0  ;;  %1220 = vmatpush1.bf16.msra.mxu1 %v2129_v41  ;;  %v2173_v41 = vld [vmem:[%s2933_s18 + $0x64] ss:$8 sps:$4 sm:$0xff]  }
 0x229   :  { %1221 = vmatprep.subr.bf16.mxu1 %v2134_v43  ;;  %v2176_v43 = vld [vmem:[%s2933_s18 + $0x74] ss:$8 sps:$4 sm:$0xff]  }
 0x22c   :  { %1222 = vmatpush1.bf16.msra.mxu1 %v2132_v44  ;;  %v2174_v44 = vld [vmem:[%s2933_s18 + $0x70] ss:$8 sps:$4 sm:$0xff]  }
 0x22d   :  { %1223 = vmatprep.subr.bf16.mxu1 %v2137_v45  ;;  %v2179_v45 = vld [vmem:[%s2933_s18 + $0x84] ss:$8 sps:$4 sm:$0xff]  }
 0x230   :  { %1224 = vmatpush1.bf16.msra.mxu1 %v2135_v46  ;;  %v2177_v46 = vld [vmem:[%s2933_s18 + $0x80] ss:$8 sps:$4 sm:$0xff]  }
 0x231   :  { %1225 = vmatprep.subr.bf16.mxu1 %v2140_v47  ;;  %v2182_v47 = vld [vmem:[%s2933_s18 + $0x94] ss:$8 sps:$4 sm:$0xff]  }
 0x234   :  { %1226 = vmatpush1.bf16.msra.mxu1 %v2138_v48  ;;  %v2180_v48 = vld [vmem:[%s2933_s18 + $0x90] ss:$8 sps:$4 sm:$0xff]  }
 0x235   :  { %1227 = vmatprep.subr.bf16.mxu1 %v2143_v49 }
 0x238   :  { %1228 = vmatpush1.bf16.msra.mxu1 %v2141_v50 }
 0x239   :  { %1229 = vmatprep.subr.bf16.mxu1 %v2146_v51 }
 0x23c   :  { %1230 = vmatpush1.bf16.msra.mxu1 %v2144_v52 }
 0x23d   :  { %1231 = vmatprep.subr.bf16.mxu1 %v2149_v53 }
 0x240   :  { %1232 = vmatpush1.bf16.msra.mxu1 %v2147_v54 }
 0x241   :  { %1233 = vmatprep.subr.bf16.mxu1 %v2152_v55 }
 0x243   :  { %v764_v7 = vpop.f32.mrb[4].mxu1 }
 0x244   :  { %v1929_v8 = vpop.f32.mrb[5].mxu1  ;;  %v887_v28 = vpack.c.bf16 %v764_v7, %v764_v7  ;;  %1234 = vmatpush1.bf16.msra.mxu1 %v2150_v56  ;;  %v2185_v56 = vld [vmem:[%s2933_s18 + $0xa4] ss:$8 sps:$4 sm:$0xff]  }
 0x245   :  { %v767_v9 = vpop.f32.mrb[6].mxu1 }
 0x246   :  { %v1930_v10 = vpop.f32.mrb[7].mxu1 }
 0x24b   :  { %v807_v11 = vpop.f32.mrb[8].mxu1 }
 0x24c   :  { %v904_v13 = vpack.c.bf16 %v807_v11, %v807_v11  ;;  %v1935_v14 = vpop.f32.mrb[9].mxu1 }
 0x24d   :  { %v810_v15 = vpop.f32.mrb[10].mxu1 }
 0x24e   :  { %v1936_v16 = vpop.f32.mrb[11].mxu1  ;;  %1954 = vmatmul.mubr.bf16.vlgmr.msra.gmra.mrb[8].mxu0 %v904_v13 }
 0x24f   :  { %1958 = vmatpush3.bf16.msra.mxu0 %v2097_v12  ;;  %1973 = vmatprep.mubr.msk.bf16.mxu0 %vm2261_vm0, %v2260_v59 }
 0x250   :  { %1959 = vmatprep.subr.bf16.mxu0 %v2260_v59 }
 0x253   :  { %1960 = vmatpush3.bf16.msra.mxu0 %v2098_v17  ;;  %v1381_v17 = vld [vmem:[%s2930_s15] sm:$0x3] }
 0x254   :  { %1961 = vmatprep.subr.bf16.mxu0 %v2260_v59 }
 0x257   :  { %1962 = vmatpush3.bf16.msra.mxu0 %v2099_v18  ;;  %v1386_v18 = vrot.slane %v1381_v17, %v2637_v21 }
 0x258   :  { %1963 = vmatprep.subr.bf16.mxu0 %v2260_v59 }
 0x25b   :  { %1964 = vmatpush3.bf16.msra.mxu0 %v2100_v19 }
 0x25c   :  { %1965 = vmatprep.subr.bf16.mxu0 %v2260_v59 }
 0x25f   :  { %1966 = vmatpush3.bf16.msra.mxu0 %v2101_v20  ;;  %v1390_v20 = vrot.slane %v1381_v17, %v2642_v23 }
 0x260   :  { %1967 = vmatprep.subr.bf16.mxu0 %v2260_v59 }
 0x263   :  { %1968 = vmatpush3.bf16.msra.mxu0 %v2102_v22 }
 0x264   :  { %1969 = vmatprep.subr.bf16.mxu0 %v2260_v59 }
 0x267   :  { %1970 = vmatpush3.bf16.msra.mxu0 %v2103_v24 }
 0x268   :  { %1971 = vmatprep.subr.bf16.mxu0 %v2260_v59  ;;  %v2108_v59 = vld [vmem:[%s2928_s13 + $0x10] ss:$8 sps:$4 sm:$0xff]  }
 0x26b   :  { %1972 = vmatpush3.bf16.msra.mxu0 %v2104_v25 }
 0x26c   :  { %1340 = vmatprep.subr.bf16.mxu0 %v2107_v26 }
 0x26e   :  { %1974 = vmatmul.mubr.bf16.vlgmr.msra.gmra.mrb[12].mxu0 %v887_v28 }
 0x26f   :  { %1341 = vmatpush1.bf16.msra.mxu0 %v2105_v27  ;;  %1372 = vmatprep.mubr.bf16.mxu0 %v2259_v0  ;;  %v2114_v0 = vld [vmem:[%s2928_s13 + $0x30] ss:$8 sps:$4 sm:$0xff]  }
 0x270   :  { %1342 = vmatprep.subr.bf16.mxu0 %v2110_v29 }
 0x273   :  { %1343 = vmatpush1.bf16.msra.mxu0 %v2108_v59 }
 0x274   :  { %1344 = vmatprep.subr.bf16.mxu0 %v2113_v30  ;;  %v2153_v30 = vld [vmem:[%s2933_s18] ss:$8 sps:$4 sm:$0xff]  }
 0x277   :  { %1345 = vmatpush1.bf16.msra.mxu0 %v2111_v31  ;;  %v2155_v31 = vld [vmem:[%s2933_s18 + $0x4] ss:$8 sps:$4 sm:$0xff]  }
 0x278   :  { %1346 = vmatprep.subr.bf16.mxu0 %v2116_v32  ;;  %v2158_v32 = vld [vmem:[%s2933_s18 + $0x14] ss:$8 sps:$4 sm:$0xff]   ;;  %1648 = vmatprep.subr.bf16.mxu1 %v2155_v31 }
 0x27b   :  { %1347 = vmatpush1.bf16.msra.mxu0 %v2114_v0  ;;  %v2156_v0 = vld [vmem:[%s2933_s18 + $0x10] ss:$8 sps:$4 sm:$0xff]  }
 0x27c   :  { %1348 = vmatprep.subr.bf16.mxu0 %v2119_v33  ;;  %v2161_v33 = vld [vmem:[%s2933_s18 + $0x24] ss:$8 sps:$4 sm:$0xff]  }
 0x27f   :  { %1349 = vmatpush1.bf16.msra.mxu0 %v2117_v34  ;;  %v2159_v34 = vld [vmem:[%s2933_s18 + $0x20] ss:$8 sps:$4 sm:$0xff]  }
 0x280   :  { %1350 = vmatprep.subr.bf16.mxu0 %v2122_v35  ;;  %v2164_v35 = vld [vmem:[%s2933_s18 + $0x34] ss:$8 sps:$4 sm:$0xff]  }
 0x283   :  { %1351 = vmatpush1.bf16.msra.mxu0 %v2120_v36  ;;  %v2162_v36 = vld [vmem:[%s2933_s18 + $0x30] ss:$8 sps:$4 sm:$0xff]  }
 0x284   :  { %1352 = vmatprep.subr.bf16.mxu0 %v2125_v37  ;;  %v2167_v37 = vld [vmem:[%s2933_s18 + $0x44] ss:$8 sps:$4 sm:$0xff]  }
 0x287   :  { %1353 = vmatpush1.bf16.msra.mxu0 %v2123_v38  ;;  %v2165_v38 = vld [vmem:[%s2933_s18 + $0x40] ss:$8 sps:$4 sm:$0xff]  }
 0x288   :  { %1354 = vmatprep.subr.bf16.mxu0 %v2128_v39  ;;  %v2170_v39 = vld [vmem:[%s2933_s18 + $0x54] ss:$8 sps:$4 sm:$0xff]  }
 0x28b   :  { %1355 = vmatpush1.bf16.msra.mxu0 %v2126_v40  ;;  %v2168_v40 = vld [vmem:[%s2933_s18 + $0x50] ss:$8 sps:$4 sm:$0xff]  }
 0x28e   :  { %1373 = vmatmul.mubr.bf16.vlgmr.msra.gmra.mrb[16].mxu0 %v887_v28 }
 0x2fa   :  { %v2780_v57 = vpop.f32.mrb[12].mxu1 }
 0x2fb   :  { %v1699_v58 = vmul.f32 %v2780_v57, %v2780_v57  ;;  %v2784_v60 = vpop.f32.mrb[13].mxu1 }
 0x2fc   :  { %v1700_v61 = vmul.f32 %v2784_v60, %v2784_v60 }
 0x2fe   :  { %v2788_v62 = vadd.f32 %v1700_v61, %v1699_v58  ;;  %v2183_v58 = vld [vmem:[%s2933_s18 + $0xa0] ss:$8 sps:$4 sm:$0xff]   ;;  %v2188_v61 = vld [vmem:[%s2933_s18 + $0xb4] ss:$8 sps:$4 sm:$0xff]  }
 0x321   :  { %v1003_v63 = vpop.f32.mrb[8].mxu0 }
 0x322   :  { %v1955_v1 = vpop.f32.mrb[9].mxu0 }
 0x323   :  { %v1006_v2 = vpop.f32.mrb[10].mxu0  ;;  %v2189_v1 = vld [vmem:[%s2933_s18 + $0xc0] ss:$8 sps:$4 sm:$0xff]  }
 0x324   :  { %v1956_v3 = vpop.f32.mrb[11].mxu0  ;;  %v2194_v2 = vld [vmem:[%s2933_s18 + $0xd4] ss:$8 sps:$4 sm:$0xff]  }
 0x325   :  { %v2192_v3 = vld [vmem:[%s2933_s18 + $0xd0] ss:$8 sps:$4 sm:$0xff]  }
 0x341   :  { %v1091_v4 = vpop.f32.mrb[12].mxu0 }
 0x342   :  { %v1092_v6 = vadd.f32 %v1091_v4, %v1003_v63  ;;  %v1975_v7 = vpop.f32.mrb[13].mxu0  ;;  %v2186_v63 = vld [vmem:[%s2933_s18 + $0xb0] ss:$8 sps:$4 sm:$0xff]   ;;  %v2197_v4 = vld [vmem:[%s2933_s18 + $0xe4] ss:$8 sps:$4 sm:$0xff]  }
 0x343   :  { %v1094_v8 = vpop.f32.mrb[14].mxu0  ;;  %v2198_v7 = vld [vmem:[%s2933_s18 + $0xf0] ss:$8 sps:$4 sm:$0xff]  }
 0x344   :  { %v1104_v9 = vadd.f32 %v1809_v5, %v1092_v6  ;;  %v1976_v10 = vpop.f32.mrb[15].mxu0  ;;  %v2195_v5 = vld [vmem:[%s2933_s18 + $0xe0] ss:$8 sps:$4 sm:$0xff]   ;;  %v2200_v6 = vld [vmem:[%s2933_s18 + $0xf4] ss:$8 sps:$4 sm:$0xff]  }
 0x346   :  { %v1105_v11 = vmax.f32 %v1104_v9, 0.0 }
 0x348   :  { %v1122_v12 = vpack.c.bf16 %v1105_v11, %v1105_v11  ;;  %v1412_v11 = vld [vmem:[%s2931_s16] sm:$0x3] }
 0x34a   :  { %1252 = vmatmul.mubr.bf16.vlgmr.msra.gmra.mrb[16].mxu1 %v1122_v12  ;;  %v1426_v12 = vld [vmem:[%s2932_s17] sm:$0x3] }
 0x34b   :  { %1649 = vmatpush1.bf16.msra.mxu1 %v2153_v30  ;;  %v1431_v17 = vrot.slane %v1426_v12, %v2637_v21 }
 0x34c   :  { %1650 = vmatprep.subr.bf16.mxu1 %v2158_v32 }
 0x34f   :  { %1651 = vmatpush1.bf16.msra.mxu1 %v2156_v0 }
 0x350   :  { %1652 = vmatprep.subr.bf16.mxu1 %v2161_v33 }
 0x353   :  { %1653 = vmatpush1.bf16.msra.mxu1 %v2159_v34 }
 0x354   :  { %1654 = vmatprep.subr.bf16.mxu1 %v2164_v35 }
 0x357   :  { %1655 = vmatpush1.bf16.msra.mxu1 %v2162_v36 }
 0x358   :  { %1656 = vmatprep.subr.bf16.mxu1 %v2167_v37 }
 0x35b   :  { %1657 = vmatpush1.bf16.msra.mxu1 %v2165_v38 }
 0x35c   :  { %1658 = vmatprep.subr.bf16.mxu1 %v2170_v39 }
 0x35f   :  { %1659 = vmatpush1.bf16.msra.mxu1 %v2168_v40 }
 0x360   :  { %1660 = vmatprep.subr.bf16.mxu1 %v2173_v41 }
 0x361   :  { %v1374_v13 = vpop.f32.mrb[16].mxu0 }
 0x362   :  { %v1376_v14 = vpop.f32.mrb[17].mxu0 }
 0x363   :  { %v1378_v15 = vpop.f32.mrb[18].mxu0  ;;  %1661 = vmatpush1.bf16.msra.mxu1 %v2171_v42 }
 0x364   :  { %v1379_v16 = vpop.f32.mrb[19].mxu0  ;;  %1662 = vmatprep.subr.bf16.mxu1 %v2176_v43 }
 0x367   :  { %1663 = vmatpush1.bf16.msra.mxu1 %v2174_v44 }
 0x368   :  { %1664 = vmatprep.subr.bf16.mxu1 %v2179_v45 }
 0x36b   :  { %1665 = vmatpush1.bf16.msra.mxu1 %v2177_v46 }
 0x36c   :  { %1666 = vmatprep.subr.bf16.mxu1 %v2182_v47 }
 0x36f   :  { %1667 = vmatpush1.bf16.msra.mxu1 %v2180_v48 }
 0x370   :  { %1668 = vmatprep.subr.bf16.mxu1 %v2185_v56 }
 0x373   :  { %1669 = vmatpush1.bf16.msra.mxu1 %v2183_v58 }
 0x374   :  { %1670 = vmatprep.subr.bf16.mxu1 %v2188_v61 }
 0x377   :  { %1671 = vmatpush1.bf16.msra.mxu1 %v2186_v63 }
 0x41d   :  { %v1253_v19 = vpop.f32.mrb[16].mxu1 }
 0x41e   :  { %v1375_v22 = vadd.f32 %v1374_v13, %v1253_v19  ;;  %v1255_v24 = vpop.f32.mrb[17].mxu1  ;;  %v1417_v13 = vrot.slane %v1412_v11, %v2637_v21 }
 0x41f   :  { %v1377_v25 = vadd.f32 %v1376_v14, %v1255_v24  ;;  %v1257_v26 = vpop.f32.mrb[18].mxu1  ;;  %v1421_v14 = vrot.slane %v1412_v11, %v2642_v23 }
 0x420   :  { %v1258_v27 = vpop.f32.mrb[19].mxu1  ;;  %v1393_v28 = vadd.f32 %v1386_v18, %v1375_v22  ;;  %v1435_v18 = vrot.slane %v1426_v12, %v2642_v23 }
 0x421   :  { %v1394_v29 = vadd.f32 %v1390_v20, %v1377_v25 }
 0x423   :  { %v1395_v59 = vadd.f32 %v1394_v29, %v1393_v28 }
 0x425   :  { %1396 = vadd.xlane.f32.xlu1 %v1395_v59  ;;  %v1476_v59 = vld [vmem:[%s2934_s19] sm:$0x3] }
 0x426   :  { %v1481_v30 = vrot.slane %v1476_v59, %v2637_v21  ;;  %v1485_v31 = vrot.slane %v1476_v59, %v2642_v23 }
 0x4b2   :  { %v1397_v49 = vpop.xlane.xlu1 %1396 }
 0x4b3   :  { %v1399_v50 = vmul.f32 0.00390625, %v1397_v49 }
 0x4b5   :  { %v1400_v51 = vsub.f32 %v1393_v28, %v1399_v50  ;;  %v1401_v52 = vsub.f32 %v1394_v29, %v1399_v50 }
 0x4b7   :  { %v1402_v53 = vmul.f32 %v1400_v51, %v1400_v51  ;;  %v1403_v54 = vmul.f32 %v1401_v52, %v1401_v52 }
 0x4b9   :  { %v1404_v55 = vadd.f32 %v1403_v54, %v1402_v53 }
 0x4bb   :  { %1405 = vadd.xlane.f32.xlu1 %v1404_v55 }
 0x4bf   :  { %1702 = vadd.xlane.f32.xlu1 %v2788_v62  ;;  %v2191_v62 = vld [vmem:[%s2933_s18 + $0xc4] ss:$8 sps:$4 sm:$0xff]  }
 0x4c0   :  { %1672 = vmatprep.subr.bf16.mxu1 %v2191_v62 }
 0x4c1   :  { %1673 = vmatpush1.bf16.msra.mxu1 %v2189_v1 }
 0x4c2   :  { %1674 = vmatprep.subr.bf16.mxu1 %v2194_v2 }
 0x4c5   :  { %1675 = vmatpush1.bf16.msra.mxu1 %v2192_v3 }
 0x4c6   :  { %1676 = vmatprep.subr.bf16.mxu1 %v2197_v4 }
 0x4c9   :  { %1677 = vmatpush1.bf16.msra.mxu1 %v2195_v5 }
 0x4ca   :  { %1678 = vmatprep.subr.bf16.mxu1 %v2200_v6 }
 0x4cd   :  { %1679 = vmatpush1.bf16.msra.mxu1 %v2198_v7 }
 0x548   :  { %v1406_v8 = vpop.xlane.xlu1 %1405 }
 0x549   :  { %v1407_v9 = vmul.f32 0.00390625, %v1406_v8 }
 0x54b   :  { %v1408_v10 = vadd.f32 1e-05, %v1407_v9 }
 0x54c   :  { %v1703_v43 = vpop.xlane.xlu1 %1702 }
 0x54d   :  { %2201 = vrsqrt.f32 %v1408_v10  ;;  %v1706_v21 = vmax.f32 %v1703_v43, 1e-16 }
 0x54f   :  { %2203 = vrsqrt.f32 %v1706_v21 }
 0x557   :  { %v2202_v15 = vpop.eup %2201 }
 0x558   :  { %v1411_v16 = vmul.f32 %v2202_v15, %v1401_v52  ;;  %v1410_v19 = vmul.f32 %v2202_v15, %v1400_v51 }
 0x559   :  { %v2204_v45 = vpop.eup %2203 }
 0x55a   :  { %v1425_v20 = vmul.f32 %v1421_v14, %v1411_v16  ;;  %v1424_v22 = vmul.f32 %v1417_v13, %v1410_v19 }
 0x55c   :  { %v1439_v24 = vadd.f32 %v1435_v18, %v1425_v20  ;;  %v1438_v25 = vadd.f32 %v1431_v17, %v1424_v22 }
 0x55e   :  { %v1441_v26 = vmax.f32 %v1439_v24, 0.0  ;;  %v1440_v27 = vmax.f32 %v1438_v25, 0.0 }
 0x560   :  { %v1443_v28 = vpack.c.bf16 %v1441_v26, %v1441_v26  ;;  %v1442_v29 = vpack.c.bf16 %v1440_v27, %v1440_v27 }
 0x562   :  { %1680 = vmatprep.mubr.bf16.mxu1 %v1443_v28 }
 0x563   :  { %1681 = vmatmul.mubr.bf16.vlgmr.msra.gmra.mrb[20].mxu1 %v1442_v29 }
 0x636   :  { %v1682_v32 = vpop.f32.mrb[20].mxu1 }
 0x637   :  { %v1683_v0 = vadd.f32 %v1682_v32, %v1481_v30  ;;  %v1684_v33 = vpop.f32.mrb[21].mxu1 }
 0x638   :  { %v1685_v34 = vadd.f32 %v1684_v33, %v1485_v31  ;;  %v1686_v35 = vpop.f32.mrb[22].mxu1 }
 0x639   :  { %v1689_v36 = vmul.f32 %v1683_v0, %v2780_v57  ;;  %v1694_v37 = vmul.f32 %v1683_v0, %v1683_v0  ;;  %v1687_v38 = vpop.f32.mrb[23].mxu1 }
 0x63a   :  { %v1690_v39 = vmul.f32 %v1685_v34, %v2784_v60  ;;  %v1695_v40 = vmul.f32 %v1685_v34, %v1685_v34 }
 0x63c   :  { %v1696_v41 = vadd.f32 %v1695_v40, %v1694_v37  ;;  %v1691_v42 = vadd.f32 %v1690_v39, %v1689_v36 }
 0x63e   :  { %1697 = vadd.xlane.f32.xlu0 %v1696_v41  ;;  %1692 = vadd.xlane.f32.xlu1 %v1691_v42 }
 0x6cb   :  { %v1698_v44 = vpop.xlane.xlu0 %1697  ;;  %v1693_v48 = vpop.xlane.xlu1 %1692 }
 0x6cc   :  { %v1704_v23 = vmax.f32 %v1698_v44, 1e-16 }
 0x6ce   :  { %2205 = vrsqrt.f32 %v1704_v23 }
 0x6d8   :  { %v2206_v46 = vpop.eup %2205 }
 0x6d9   :  { %v1708_v47 = vmul.f32 %v2206_v46, %v2204_v45 }
 0x6db   :  { %v1709_v57 = vmul.f32 %v1708_v47, %v1693_v48 }
 0x6dd   :  { %1710 = vst [vmem:[%s2935_s20] sm:$0xff] %v1709_v57 }
 0x6de   :  { %1715 = vsyncpa [#allocation3], 1 }
 0x6df   :  { %1716 = vsyncpa [#allocation5], 1 }

</bundles_post_ra>
